<compile_context>
chip_gen: v5e
topology: v5e:2x2
jax: 0.10.0
libtpu: 0.0.40
codegen_flags: <defaults>
</compile_context>

<pallas_src>
import functools

import jax
import jax.numpy as jnp
from jax.experimental import pallas as pl
from jax.experimental.pallas import tpu as pltpu


_NEG_BIG = -1e30  # pad value for out-of-range class columns / batch rows


def _round_up(n, mult):
    return (n + mult - 1) // mult * mult


def _am_loss_kernel(x_ref, y_ref, loss_ref, m_sc, l_sc, t_sc, *, s, m, block_c):
    """One (TB, TC) tile of the streaming AM-softmax cross-entropy.

    Grid = (batch_tiles, class_tiles); class axis is the (inner) reduction axis.
    m_sc/l_sc/t_sc: (TB, 1) f32 running max / running sum-exp / target logit.
    """
    k = pl.program_id(1)

    @pl.when(k == 0)
    def _():
        m_sc[...] = jnp.full_like(m_sc, -jnp.inf)
        l_sc[...] = jnp.zeros_like(l_sc)
        t_sc[...] = jnp.zeros_like(t_sc)

    xs = x_ref[...].astype(jnp.float32) * jnp.float32(s)        # (TB, TC)
    labels = y_ref[...]                                          # (TB, 1) int32

    # One-hot via global-column iota compare (no scatter on TPU). Mask computed
    # once and reused for both the margin subtraction and the target extraction.
    col = k * block_c + jax.lax.broadcasted_iota(jnp.int32, xs.shape, 1)
    is_label = col == labels                                     # (TB, TC)

    # Single select applies the additive margin:  out = s*x - s*m at the label.
    out = jnp.where(is_label, xs - jnp.float32(s * m), xs)

    # Target-logit contribution from this tile (0 unless the label column is here).
    t_sc[...] += jnp.sum(jnp.where(is_label, out, 0.0), axis=-1, keepdims=True)

    # Online logsumexp (single exp pass per element).
    tile_max = jnp.max(out, axis=-1, keepdims=True)
    m_new = jnp.maximum(m_sc[...], tile_max)
    l_sc[...] = l_sc[...] * jnp.exp(m_sc[...] - m_new) + jnp.sum(
        jnp.exp(out - m_new), axis=-1, keepdims=True)
    m_sc[...] = m_new

    @pl.when(k == pl.num_programs(1) - 1)
    def _():
        # loss_i = logsumexp(out_i) - out_i[y_i]
        loss_ref[...] = m_sc[...] + jnp.log(l_sc[...]) - t_sc[...]


def am_loss_reference(x, y, *, s, m, class_num):
    """Pure-XLA reference (also used for tiny shapes where Pallas launch
    overhead dominates)."""
    xs = jnp.float32(s) * x.astype(jnp.float32)
    onehot = jax.nn.one_hot(y, class_num, dtype=jnp.float32) * jnp.float32(s * m)
    out = xs - onehot
    lse = jax.scipy.special.logsumexp(out, axis=-1)
    target = jnp.take_along_axis(out, y[:, None].astype(jnp.int32), axis=-1)[:, 0]
    return jnp.mean(lse - target)


def am_loss(x, y, *, s, m, class_num, block_b=256, block_c=1024,
            vmem_limit_bytes=32 * 1024 * 1024, use_pallas=None):
    """x: (B, class_num) float logits (f32 or bf16); y: (B,) int labels.

    Returns the scalar f32 AM-softmax cross-entropy loss (mean over batch).
    """
    batch = x.shape[0]
    assert x.shape == (batch, class_num)

    # Tiny problems: pallas_call per-step overhead + underfilled vregs dominate.
    if use_pallas is None:
        use_pallas = batch * class_num >= (1 << 15)
    if not use_pallas:
        return am_loss_reference(x, y, s=s, m=m, class_num=class_num)

    # Lane/sublane-aligned tiles: class tile multiple of 128, batch tile of 8.
    tb = min(block_b, _round_up(batch, 8))
    tc = min(block_c, _round_up(class_num, 128))
    b_pad = _round_up(batch, tb)
    c_pad = _round_up(class_num, tc)

    if (b_pad, c_pad) != (batch, class_num):
        # Padded class columns get a huge negative value -> exp underflows to 0
        # and they can never win the max; padded rows are sliced off below.
        x = jnp.pad(x, ((0, b_pad - batch), (0, c_pad - class_num)),
                    constant_values=_NEG_BIG)
    y2d = jnp.pad(y.astype(jnp.int32), (0, b_pad - batch)).reshape(b_pad, 1)

    kernel = functools.partial(_am_loss_kernel, s=float(s), m=float(m), block_c=tc)

    grid = (b_pad // tb, c_pad // tc)
    per_row = pl.pallas_call(
        kernel,
        out_shape=jax.ShapeDtypeStruct((b_pad, 1), jnp.float32),
        grid_spec=pltpu.PrefetchScalarGridSpec(
            num_scalar_prefetch=0,
            grid=grid,
            in_specs=[
                pl.BlockSpec((tb, tc), lambda i, k: (i, k)),   # logits tile
                pl.BlockSpec((tb, 1), lambda i, k: (i, 0)),    # labels per batch tile
            ],
            out_specs=pl.BlockSpec((tb, 1), lambda i, k: (i, 0)),  # per-row losses
            scratch_shapes=[pltpu.VMEM((tb, 1), jnp.float32)] * 3,
        ),
        compiler_params=pltpu.CompilerParams(
            dimension_semantics=("parallel", "arbitrary"),
            vmem_limit_bytes=vmem_limit_bytes,
        ),
    )(x, y2d)

    # Mean over the true batch (padded rows excluded); trivial XLA reduction.
    return jnp.mean(per_row[:batch, 0])


if __name__ == "__main__":
    # Typical AM-softmax hyperparameters.
    S = 30.0
    M = 0.35

    key = jax.random.PRNGKey(0)
    k1, k2, k3, k4 = jax.random.split(key, 4)

    # Case 1: small demo shape (8 x 32) -> single (8, 128) tile with class padding.
    B1, C1 = 8, 32
    x1 = jax.random.normal(k1, (B1, C1), dtype=jnp.float32)
    y1 = jax.random.randint(k2, (B1,), 0, C1, dtype=jnp.int32)
    loss1 = jax.block_until_ready(
        am_loss(x1, y1, s=S, m=M, class_num=C1, use_pallas=True))
    ref1 = am_loss_reference(x1, y1, s=S, m=M, class_num=C1)
    assert jnp.allclose(loss1, ref1, rtol=1e-5, atol=1e-4), (loss1, ref1)

    # Case 2: multi-tile 2x2 grid with non-divisible shapes; exercises the
    # online logsumexp across class tiles and the padding/masking paths.
    B2, C2 = 13, 200
    x2 = jax.random.normal(k3, (B2, C2), dtype=jnp.float32)
    y2 = jax.random.randint(k4, (B2,), 0, C2, dtype=jnp.int32)
    loss2 = jax.block_until_ready(
        am_loss(x2, y2, s=S, m=M, class_num=C2,
                block_b=8, block_c=128, use_pallas=True))
    ref2 = am_loss_reference(x2, y2, s=S, m=M, class_num=C2)
    assert jnp.allclose(loss2, ref2, rtol=1e-5, atol=1e-4), (loss2, ref2)

    print("KERNEL_OK")
</pallas_src>

<mosaic_0001>
module attributes {stable_mosaic.version = 11 : i64} {
  func.func @_am_loss_kernel(%arg0: i32, %arg1: i32, %arg2: memref<8x128xf32, #tpu.memory_space<vmem>>, %arg3: memref<8x1xi32, #tpu.memory_space<vmem>>, %arg4: memref<8x1xf32, #tpu.memory_space<vmem>>, %arg5: memref<8x1xf32, #tpu.memory_space<vmem>>, %arg6: memref<8x1xf32, #tpu.memory_space<vmem>>, %arg7: memref<8x1xf32, #tpu.memory_space<vmem>>) attributes {dimension_semantics = [#tpu.dimension_semantics<parallel>, #tpu.dimension_semantics<arbitrary>], iteration_bounds = array<i64: 1, 1>, scalar_prefetch = 0 : i64, scratch_operands = 3 : i64, tpu.core_type = #tpu.core_type<tc>, window_params = [{transform_indices = @transform_0, window_bounds = array<i64: 8, 128>}, {transform_indices = @transform_1, window_bounds = array<i64: 8, 1>}, {transform_indices = @transform_2, window_bounds = array<i64: 8, 1>}]} {
    %c0_i32 = arith.constant 0 : i32
    %0 = arith.cmpi eq, %arg1, %c0_i32 : i32
    %1 = arith.extui %0 : i1 to i32
    %c0_i32_0 = arith.constant 0 : i32
    %2 = arith.cmpi ne, %1, %c0_i32_0 : i32
    scf.if %2 {
      %cst_25 = arith.constant 0xFF800000 : f32
      %43 = vector.broadcast %cst_25 : f32 to vector<8x1xf32>
      %c0_26 = arith.constant 0 : index
      %c0_27 = arith.constant 0 : index
      %44 = vector.load %arg5[%c0_26, %c0_27] : memref<8x1xf32, #tpu.memory_space<vmem>>, vector<8x1xf32>
      tpu.vector_store %arg5[%c0_26, %c0_27], %43 {strides = array<i32>} : memref<8x1xf32, #tpu.memory_space<vmem>>, vector<8x1xf32>,
      %cst_28 = arith.constant 0.000000e+00 : f32
      %45 = vector.broadcast %cst_28 : f32 to vector<8x1xf32>
      %c0_29 = arith.constant 0 : index
      %c0_30 = arith.constant 0 : index
      %46 = vector.load %arg6[%c0_29, %c0_30] : memref<8x1xf32, #tpu.memory_space<vmem>>, vector<8x1xf32>
      tpu.vector_store %arg6[%c0_29, %c0_30], %45 {strides = array<i32>} : memref<8x1xf32, #tpu.memory_space<vmem>>, vector<8x1xf32>,
      %cst_31 = arith.constant 0.000000e+00 : f32
      %47 = vector.broadcast %cst_31 : f32 to vector<8x1xf32>
      %c0_32 = arith.constant 0 : index
      %c0_33 = arith.constant 0 : index
      %48 = vector.load %arg7[%c0_32, %c0_33] : memref<8x1xf32, #tpu.memory_space<vmem>>, vector<8x1xf32>
      tpu.vector_store %arg7[%c0_32, %c0_33], %47 {strides = array<i32>} : memref<8x1xf32, #tpu.memory_space<vmem>>, vector<8x1xf32>,
    } else {
    }
    %c0 = arith.constant 0 : index
    %c0_1 = arith.constant 0 : index
    %3 = vector.load %arg2[%c0, %c0_1] : memref<8x128xf32, #tpu.memory_space<vmem>>, vector<8x128xf32>
    %cst = arith.constant 3.000000e+01 : f32
    %4 = vector.broadcast %cst : f32 to vector<8x128xf32>
    %5 = arith.mulf %3, %4 : vector<8x128xf32>
    %c0_2 = arith.constant 0 : index
    %c0_3 = arith.constant 0 : index
    %6 = vector.load %arg3[%c0_2, %c0_3] : memref<8x1xi32, #tpu.memory_space<vmem>>, vector<8x1xi32>
    %c128_i32 = arith.constant 128 : i32
    %7 = arith.muli %arg1, %c128_i32 : i32
    %8 = tpu.iota {dimensions = array<i32: 1>} : vector<8x128xi32>
    %9 = vector.broadcast %7 : i32 to vector<8x128xi32>
    %10 = arith.addi %9, %8 : vector<8x128xi32>
    %11 = vector.broadcast %6 : vector<8x1xi32> to vector<8x128xi32>
    %12 = arith.cmpi eq, %10, %11 : vector<8x128xi32>
    %cst_4 = arith.constant 1.050000e+01 : f32
    %13 = vector.broadcast %cst_4 : f32 to vector<8x128xf32>
    %14 = arith.subf %5, %13 : vector<8x128xf32>
    %15 = arith.select %12, %14, %5 : vector<8x128xi1>, vector<8x128xf32>
    %c0_5 = arith.constant 0 : index
    %c0_6 = arith.constant 0 : index
    %16 = vector.load %arg7[%c0_5, %c0_6] : memref<8x1xf32, #tpu.memory_space<vmem>>, vector<8x1xf32>
    %cst_7 = arith.constant 0.000000e+00 : f32
    %17 = vector.broadcast %cst_7 : f32 to vector<8x128xf32>
    %18 = arith.select %12, %15, %17 : vector<8x128xi1>, vector<8x128xf32>
    %cst_8 = arith.constant dense<0.000000e+00> : vector<8xf32>
    %19 = vector.multi_reduction <add>, %18, %cst_8 [1] : vector<8x128xf32> to vector<8xf32>
    %20 = vector.shape_cast %19 : vector<8xf32> to vector<8x1xf32>
    %21 = arith.addf %16, %20 : vector<8x1xf32>
    %c0_9 = arith.constant 0 : index
    %c0_10 = arith.constant 0 : index
    %22 = vector.load %arg7[%c0_9, %c0_10] : memref<8x1xf32, #tpu.memory_space<vmem>>, vector<8x1xf32>
    tpu.vector_store %arg7[%c0_9, %c0_10], %21 {strides = array<i32>} : memref<8x1xf32, #tpu.memory_space<vmem>>, vector<8x1xf32>,
    %cst_11 = arith.constant dense<0xFF800000> : vector<8xf32>
    %23 = vector.multi_reduction <maximumf>, %15, %cst_11 [1] : vector<8x128xf32> to vector<8xf32>
    %24 = vector.shape_cast %23 : vector<8xf32> to vector<8x1xf32>
    %c0_12 = arith.constant 0 : index
    %c0_13 = arith.constant 0 : index
    %25 = vector.load %arg5[%c0_12, %c0_13] : memref<8x1xf32, #tpu.memory_space<vmem>>, vector<8x1xf32>
    %26 = arith.maximumf %25, %24 : vector<8x1xf32>
    %c0_14 = arith.constant 0 : index
    %c0_15 = arith.constant 0 : index
    %27 = vector.load %arg6[%c0_14, %c0_15] : memref<8x1xf32, #tpu.memory_space<vmem>>, vector<8x1xf32>
    %c0_16 = arith.constant 0 : index
    %c0_17 = arith.constant 0 : index
    %28 = vector.load %arg5[%c0_16, %c0_17] : memref<8x1xf32, #tpu.memory_space<vmem>>, vector<8x1xf32>
    %29 = arith.subf %28, %26 : vector<8x1xf32>
    %30 = math.exp %29 : vector<8x1xf32>
    %31 = arith.mulf %27, %30 : vector<8x1xf32>
    %32 = vector.broadcast %26 : vector<8x1xf32> to vector<8x128xf32>
    %33 = arith.subf %15, %32 : vector<8x128xf32>
    %34 = math.exp %33 : vector<8x128xf32>
    %cst_18 = arith.constant dense<0.000000e+00> : vector<8xf32>
    %35 = vector.multi_reduction <add>, %34, %cst_18 [1] : vector<8x128xf32> to vector<8xf32>
    %36 = vector.shape_cast %35 : vector<8xf32> to vector<8x1xf32>
    %37 = arith.addf %31, %36 : vector<8x1xf32>
    %c0_19 = arith.constant 0 : index
    %c0_20 = arith.constant 0 : index
    %38 = vector.load %arg6[%c0_19, %c0_20] : memref<8x1xf32, #tpu.memory_space<vmem>>, vector<8x1xf32>
    tpu.vector_store %arg6[%c0_19, %c0_20], %37 {strides = array<i32>} : memref<8x1xf32, #tpu.memory_space<vmem>>, vector<8x1xf32>,
    %c0_21 = arith.constant 0 : index
    %c0_22 = arith.constant 0 : index
    %39 = vector.load %arg5[%c0_21, %c0_22] : memref<8x1xf32, #tpu.memory_space<vmem>>, vector<8x1xf32>
    tpu.vector_store %arg5[%c0_21, %c0_22], %26 {strides = array<i32>} : memref<8x1xf32, #tpu.memory_space<vmem>>, vector<8x1xf32>,
    %c0_i32_23 = arith.constant 0 : i32
    %40 = arith.cmpi eq, %arg1, %c0_i32_23 : i32
    %41 = arith.extui %40 : i1 to i32
    %c0_i32_24 = arith.constant 0 : i32
    %42 = arith.cmpi ne, %41, %c0_i32_24 : i32
    scf.if %42 {
      %c0_25 = arith.constant 0 : index
      %c0_26 = arith.constant 0 : index
      %43 = vector.load %arg5[%c0_25, %c0_26] : memref<8x1xf32, #tpu.memory_space<vmem>>, vector<8x1xf32>
      %c0_27 = arith.constant 0 : index
      %c0_28 = arith.constant 0 : index
      %44 = vector.load %arg6[%c0_27, %c0_28] : memref<8x1xf32, #tpu.memory_space<vmem>>, vector<8x1xf32>
      %45 = math.log %44 : vector<8x1xf32>
      %46 = arith.addf %43, %45 : vector<8x1xf32>
      %c0_29 = arith.constant 0 : index
      %c0_30 = arith.constant 0 : index
      %47 = vector.load %arg7[%c0_29, %c0_30] : memref<8x1xf32, #tpu.memory_space<vmem>>, vector<8x1xf32>
      %48 = arith.subf %46, %47 : vector<8x1xf32>
      %c0_31 = arith.constant 0 : index
      %c0_32 = arith.constant 0 : index
      %49 = vector.load %arg4[%c0_31, %c0_32] : memref<8x1xf32, #tpu.memory_space<vmem>>, vector<8x1xf32>
      tpu.vector_store %arg4[%c0_31, %c0_32], %48 {strides = array<i32>} : memref<8x1xf32, #tpu.memory_space<vmem>>, vector<8x1xf32>,
    } else {
    }
    return
  }
  func.func @transform_0(%arg0: i32, %arg1: i32) -> (i32, i32) {
    %c0_i32 = arith.constant 0 : i32
    return %arg0, %arg1 : i32, i32
  }
  func.func @transform_1(%arg0: i32, %arg1: i32) -> (i32, i32) {
    %c0_i32 = arith.constant 0 : i32
    %c0_i32_0 = arith.constant 0 : i32
    return %arg0, %c0_i32 : i32, i32
  }
  func.func @transform_2(%arg0: i32, %arg1: i32) -> (i32, i32) {
    %c0_i32 = arith.constant 0 : i32
    %c0_i32_0 = arith.constant 0 : i32
    return %arg0, %c0_i32 : i32, i32
  }
}

</mosaic_0001>

<bundles_post_ra>
// kernel: tpu_custom_call.1
= control target key start
LH: loop header
LB: loop body
LE: loop exit
PB: predicated region body
PF: predicated region fallthrough
CT: control target
= control target key end

     0   :  { %v89_v0 = vmov 0   ;;  %vm15_vm0 = vcmask 7168   ;;  %v90_v2 = vmov 0.0   ;;  %v23_v4 = vlaneseq  ;;  %s123_s1 = inlined_call_operand.vmem [shape: s32[8,1], index: 1, kind: input, shape index: {}]   ;;  %s124_s0 = inlined_call_operand.vmem [shape: f32[8,128], index: 0, kind: input, shape index: {}]   ;;  %s125_s2 = inlined_call_operand.vmem [shape: f32[8,1], index: 2, kind: output, shape index: {}]  }
   0x1   :  { %81 = vset.pattern.permute.xlu0 %v89_v0  ;;  %v21_v1 = vld [vmem:[%s123_s1] sm:$0xff]  ;;  %82 = vset.pattern.permute.xlu1 %v89_v0  ;;  %18 = vst.msk [vmem:[#allocation4] sm:$0xff] %vm15_vm0, %v90_v2  ;;  %v91_v11 = vmov -inf  }
   0x2   :  { %28 = vperm.xlu0 %81, %v21_v1   ;;  %17 = vst.msk [vmem:[#allocation3] sm:$0xff] %vm15_vm0, %v90_v2  ;;  %v19_v3 = vld [vmem:[%s124_s0] sm:$0xff]  ;;  %v24_v6 = vand.u32 127, %v23_v4 }
   0x3   :  { %v20_v5 = vmul.f32 30.0, %v19_v3  ;;  %16 = vst.msk [vmem:[#allocation2] sm:$0xff] %vm15_vm0, %v91_v11 }
   0x5   :  { %v77_v7 = vadd.f32 -10.5, %v20_v5 }
   0x8   :  { %v33_v12 = vld [vmem:[#allocation4] sm:$0xff] }
   0x9   :  { %v44_v25 = vld [vmem:[#allocation3] sm:$0xff] }
   0xa   :  { %v42_v13 = vld [vmem:[#allocation2] sm:$0xff] }
  0x74   :  { %v29_v8 = vpop.permute.xlu0 %28 }
  0x75   :  { %vm30_vm1 = vcmp.eq.s32.totalorder %v24_v6, %v29_v8 }
  0x76   :  { %v34_v9 = vsel %vm30_vm1, %v77_v7, 0.0  ;;  %v32_v10 = vsel %vm30_vm1, %v77_v7, %v20_v5 }
  0x77   :  { %35 = vadd.xlane.f32.xlu2 %v34_v9  ;;  %40 = vmax.xlane.f32.xlu0 %v32_v10 }
  0xea   :  { %v36_v14 = vpop.xlane.xlu2 %35  ;;  %v41_v15 = vpop.xlane.xlu0 %40 }
  0xeb   :  { %v37_v16 = vadd.f32 %v36_v14, %v33_v12  ;;  %v43_v17 = vmax.f32 %v42_v13, %v41_v15 }
  0xed   :  { %39 = vst.msk [vmem:[#allocation4] sm:$0xff] %vm15_vm0, %v37_v16  ;;  %v45_v18 = vsub.f32 %v42_v13, %v43_v17  ;;  %51 = vperm.xlu1 %82, %v43_v17  }
  0xee   :  { %61 = vst.msk [vmem:[#allocation2] sm:$0xff] %vm15_vm0, %v43_v17 }
  0xef   :  { %v46_v23 = vmul.f32 1.442695, %v45_v18 }
  0xf4   :  { %v70_v34 = vld [vmem:[#allocation4] sm:$0xff] }
  0xf5   :  { %v65_v32 = vld [vmem:[#allocation2] sm:$0xff] }
 0x15f   :  { %v52_v19 = vpop.permute.xlu1 %51 }
 0x160   :  { %v54_v20 = vsub.f32 %v32_v10, %v52_v19 }
 0x162   :  { %v55_v21 = vmul.f32 1.442695, %v54_v20 }
 0x164   :  { %83 = vpow2.f32 %v55_v21 }
 0x165   :  { %85 = vpow2.f32 %v46_v23 }
 0x16a   :  { %v84_v22 = vpop.eup %83 }
 0x16b   :  { %57 = vadd.xlane.f32.xlu1 %v84_v22  ;;  %v86_v24 = vpop.eup %85 }
 0x16c   :  { %v48_v26 = vmul.f32 %v86_v24, %v44_v25 }
 0x1de   :  { %v58_v27 = vpop.xlane.xlu1 %57 }
 0x1df   :  { %v59_v28 = vadd.f32 %v58_v27, %v48_v26 }
 0x1e1   :  { %60 = vst.msk [vmem:[#allocation3] sm:$0xff] %vm15_vm0, %v59_v28 }
 0x1e8   :  { %v66_v29 = vld [vmem:[#allocation3] sm:$0xff] }
 0x1e9   :  { %87 = vlog2.f32 %v66_v29 }
 0x1ef   :  { %v88_v30 = vpop.eup %87 }
 0x1f0   :  { %v68_v31 = vmul.f32 0.6931472, %v88_v30 }
 0x1f2   :  { %v69_v33 = vadd.f32 %v68_v31, %v65_v32 }
 0x1f4   :  { %v71_v35 = vsub.f32 %v69_v33, %v70_v34 }
 0x1f6   :  { %72 = vst.msk [vmem:[%s125_s2] sm:$0xff] %vm15_vm0, %v71_v35 }

</bundles_post_ra>
